<compile_context>
chip_gen: v7x
topology: tpu7x:2x2x1
jax: 0.10.0
libtpu: 0.0.40
codegen_flags: <defaults>
</compile_context>

<pallas_src>
import jax
import jax.numpy as jnp
from jax.experimental import pallas as pl
from jax.experimental.pallas import tpu as pltpu


def _two_layer_kernel(x_ref, w1_ref, w2_ref, o_ref, h_acc_ref):
    """One (batch-tile, K-tile) grid step.

    x_ref  : (tm, tk)     bf16   batch-tile x K-slice of the input
    w1_ref : (tk, H)      bf16   K-slice of W1
    w2_ref : (H, Dout)    bf16   full W2 (resident; block index constant)
    o_ref  : (tm, Dout)   f32    output tile (written only on last K step)
    h_acc  : (tm, H)      f32    VMEM accumulator for the hidden activation
    """
    k = pl.program_id(1)

    # Layer 1 (model-parallel linear): accumulate x @ W1 over the K (Din) axis.
    @pl.when(k == 0)
    def _():
        h_acc_ref[...] = jnp.zeros_like(h_acc_ref)

    h_acc_ref[...] += jnp.dot(
        x_ref[...], w1_ref[...], preferred_element_type=jnp.float32)

    # On the last K step: relu on the f32 accumulator, cast to bf16 for the
    # MXU, then layer 2 (data-parallel linear) and the single output store.
    @pl.when(k == pl.num_programs(1) - 1)
    def _():
        h = jnp.maximum(h_acc_ref[...], 0.0).astype(w2_ref.dtype)
        out = jnp.dot(h, w2_ref[...], preferred_element_type=jnp.float32)
        o_ref[...] = out.astype(o_ref.dtype)


def two_layer_model(x, w1, w2, *, tm=256, tk=512, out_dtype=jnp.float32):
    """Fused relu-MLP: relu(x @ w1) @ w2.

    Grid = (B // tm, Din // tk); the hidden activation stays in a VMEM f32
    scratch per batch tile (no HBM writeback of h). Batch axis is 'parallel'
    (sharded across TensorCores where available); the Din reduction axis is
    last and 'arbitrary'.
    """
    B, Din = x.shape
    Din2, H = w1.shape
    H2, Dout = w2.shape
    assert Din == Din2 and H == H2, "shape mismatch between x, w1, w2"

    tm = min(tm, B)
    tk = min(tk, Din)
    assert B % tm == 0 and Din % tk == 0, (
        "batch and in_features must be divisible by the tile sizes")

    grid = (B // tm, Din // tk)

    itemsize = jnp.dtype(x.dtype).itemsize
    bytes_accessed = (
        B * Din * itemsize            # x read
        + Din * H * itemsize          # W1 read
        + H * Dout * itemsize         # W2 read
        + B * Dout * jnp.dtype(out_dtype).itemsize)  # out write
    cost = pl.CostEstimate(
        flops=2 * B * Din * H + 2 * B * H * Dout,
        transcendentals=0,
        bytes_accessed=bytes_accessed)

    return pl.pallas_call(
        _two_layer_kernel,
        out_shape=jax.ShapeDtypeStruct((B, Dout), out_dtype),
        grid_spec=pltpu.PrefetchScalarGridSpec(
            num_scalar_prefetch=0,
            grid=grid,
            in_specs=[
                # x: new batch tile per i, new K slice per k.
                pl.BlockSpec((tm, tk), lambda i, k: (i, k)),
                # W1: K slice per k, full hidden dim; constant along batch axis.
                pl.BlockSpec((tk, H), lambda i, k: (k, 0)),
                # W2: full weight, resident (block index constant).
                pl.BlockSpec((H, Dout), lambda i, k: (0, 0)),
            ],
            out_specs=pl.BlockSpec((tm, Dout), lambda i, k: (i, 0)),
            scratch_shapes=[pltpu.VMEM((tm, H), jnp.float32)],
        ),
        compiler_params=pltpu.CompilerParams(
            dimension_semantics=("parallel", "arbitrary"),
            vmem_limit_bytes=96 * 1024 * 1024,
        ),
        cost_estimate=cost,
    )(x, w1, w2)


# TODO(synk): with world_size > 1 the model-parallel layer-1 output would need
# a cross-device all-reduce (make_async_remote_copy + barrier semaphores +
# collective_id); single-device semantics make it an identity here.


if __name__ == "__main__":
    key = jax.random.PRNGKey(0)
    kx, k1, k2 = jax.random.split(key, 3)

    # Small but 128-lane-aligned shapes (lane-dense output, full MXU tiles,
    # exercises both the parallel batch axis and the K accumulation axis).
    batch, in_features, hidden, out_features = 256, 256, 256, 128

    x = jax.random.normal(kx, (batch, in_features), dtype=jnp.float32)
    w1 = jax.random.normal(k1, (in_features, hidden), dtype=jnp.float32) * 0.1
    w2 = jax.random.normal(k2, (hidden, out_features), dtype=jnp.float32) * 0.1

    # bf16 operands at the call boundary, f32 accumulation inside the kernel.
    xb = x.astype(jnp.bfloat16)
    w1b = w1.astype(jnp.bfloat16)
    w2b = w2.astype(jnp.bfloat16)

    # Use tile sizes that keep a multi-step grid on these small shapes so the
    # accumulator / pl.when paths are exercised.
    out = two_layer_model(xb, w1b, w2b, tm=128, tk=128)
    jax.block_until_ready(out)

    # Plain-JAX reference with the same bf16/f32-accumulate numerics.
    h_ref = jnp.maximum(
        jnp.dot(xb, w1b, preferred_element_type=jnp.float32), 0.0)
    ref = jnp.dot(h_ref.astype(jnp.bfloat16), w2b,
                  preferred_element_type=jnp.float32)

    assert out.shape == (batch, out_features)
    assert jnp.allclose(out, ref, atol=2e-2, rtol=2e-2), (
        float(jnp.max(jnp.abs(out - ref))))

    print("KERNEL_OK")
</pallas_src>

<mosaic_0001>
module attributes {stable_mosaic.version = 11 : i64} {
  func.func @_two_layer_kernel(%arg0: i32, %arg1: i32, %arg2: memref<128x128xbf16, #tpu.memory_space<vmem>>, %arg3: memref<128x256xbf16, #tpu.memory_space<vmem>>, %arg4: memref<256x128xbf16, #tpu.memory_space<vmem>>, %arg5: memref<128x128xf32, #tpu.memory_space<vmem>>, %arg6: memref<128x256xf32, #tpu.memory_space<vmem>>) attributes {dimension_semantics = [#tpu.dimension_semantics<parallel>, #tpu.dimension_semantics<arbitrary>], iteration_bounds = array<i64: 2, 2>, scalar_prefetch = 0 : i64, scratch_operands = 1 : i64, tpu.core_type = #tpu.core_type<tc>, window_params = [{transform_indices = @transform_0, window_bounds = array<i64: 128, 128>}, {transform_indices = @transform_1, window_bounds = array<i64: 128, 256>}, {pipeline_mode = #tpu.pipeline_mode<synchronous>, transform_indices = @transform_2, window_bounds = array<i64: 256, 128>}, {transform_indices = @transform_3, window_bounds = array<i64: 128, 128>}]} {
    %c0_i32 = arith.constant 0 : i32
    %0 = arith.cmpi eq, %arg1, %c0_i32 : i32
    %1 = arith.extui %0 : i1 to i32
    %c0_i32_0 = arith.constant 0 : i32
    %2 = arith.cmpi ne, %1, %c0_i32_0 : i32
    scf.if %2 {
      %cst_9 = arith.constant 0.000000e+00 : f32
      %12 = vector.broadcast %cst_9 : f32 to vector<128x256xf32>
      %c0_10 = arith.constant 0 : index
      %c0_11 = arith.constant 0 : index
      %13 = vector.load %arg6[%c0_10, %c0_11] : memref<128x256xf32, #tpu.memory_space<vmem>>, vector<128x256xf32>
      tpu.vector_store %arg6[%c0_10, %c0_11], %12 {strides = array<i32>} : memref<128x256xf32, #tpu.memory_space<vmem>>, vector<128x256xf32>,
    } else {
    }
    %c0 = arith.constant 0 : index
    %c0_1 = arith.constant 0 : index
    %3 = vector.load %arg6[%c0, %c0_1] : memref<128x256xf32, #tpu.memory_space<vmem>>, vector<128x256xf32>
    %c0_2 = arith.constant 0 : index
    %c0_3 = arith.constant 0 : index
    %4 = vector.load %arg2[%c0_2, %c0_3] : memref<128x128xbf16, #tpu.memory_space<vmem>>, vector<128x128xbf16>
    %c0_4 = arith.constant 0 : index
    %c0_5 = arith.constant 0 : index
    %5 = vector.load %arg3[%c0_4, %c0_5] : memref<128x256xbf16, #tpu.memory_space<vmem>>, vector<128x256xbf16>
    %cst = arith.constant dense<0.000000e+00> : vector<128x256xf32>
    %6 = tpu.matmul %4, %5, %cst {dimension_numbers = #tpu.dot_dimension_numbers<[1], [0], [0], [1], [0, 0, 1, 1], [], []>} : vector<128x128xbf16>, vector<128x256xbf16>, vector<128x256xf32> -> vector<128x256xf32>
    %7 = arith.addf %3, %6 : vector<128x256xf32>
    %c0_6 = arith.constant 0 : index
    %c0_7 = arith.constant 0 : index
    %8 = vector.load %arg6[%c0_6, %c0_7] : memref<128x256xf32, #tpu.memory_space<vmem>>, vector<128x256xf32>
    tpu.vector_store %arg6[%c0_6, %c0_7], %7 {strides = array<i32>} : memref<128x256xf32, #tpu.memory_space<vmem>>, vector<128x256xf32>,
    %c1_i32 = arith.constant 1 : i32
    %9 = arith.cmpi eq, %arg1, %c1_i32 : i32
    %10 = arith.extui %9 : i1 to i32
    %c0_i32_8 = arith.constant 0 : i32
    %11 = arith.cmpi ne, %10, %c0_i32_8 : i32
    scf.if %11 {
      %c0_9 = arith.constant 0 : index
      %c0_10 = arith.constant 0 : index
      %12 = vector.load %arg6[%c0_9, %c0_10] : memref<128x256xf32, #tpu.memory_space<vmem>>, vector<128x256xf32>
      %cst_11 = arith.constant 0.000000e+00 : f32
      %13 = vector.broadcast %cst_11 : f32 to vector<128x256xf32>
      %14 = arith.maximumf %12, %13 : vector<128x256xf32>
      %15 = arith.truncf %14 : vector<128x256xf32> to vector<128x256xbf16>
      %c0_12 = arith.constant 0 : index
      %c0_13 = arith.constant 0 : index
      %16 = vector.load %arg4[%c0_12, %c0_13] : memref<256x128xbf16, #tpu.memory_space<vmem>>, vector<256x128xbf16>
      %cst_14 = arith.constant dense<0.000000e+00> : vector<128x128xf32>
      %17 = tpu.matmul %15, %16, %cst_14 {dimension_numbers = #tpu.dot_dimension_numbers<[1], [0], [0], [1], [0, 0, 1, 1], [], []>} : vector<128x256xbf16>, vector<256x128xbf16>, vector<128x128xf32> -> vector<128x128xf32>
      %c0_15 = arith.constant 0 : index
      %c0_16 = arith.constant 0 : index
      %18 = vector.load %arg5[%c0_15, %c0_16] : memref<128x128xf32, #tpu.memory_space<vmem>>, vector<128x128xf32>
      tpu.vector_store %arg5[%c0_15, %c0_16], %17 {strides = array<i32>} : memref<128x128xf32, #tpu.memory_space<vmem>>, vector<128x128xf32>,
    } else {
    }
    return
  }
  func.func @transform_0(%arg0: i32, %arg1: i32) -> (i32, i32) {
    %c0_i32 = arith.constant 0 : i32
    return %arg0, %arg1 : i32, i32
  }
  func.func @transform_1(%arg0: i32, %arg1: i32) -> (i32, i32) {
    %c0_i32 = arith.constant 0 : i32
    %c0_i32_0 = arith.constant 0 : i32
    return %arg1, %c0_i32 : i32, i32
  }
  func.func @transform_2(%arg0: i32, %arg1: i32) -> (i32, i32) {
    %c0_i32 = arith.constant 0 : i32
    %c0_i32_0 = arith.constant 0 : i32
    %c0_i32_1 = arith.constant 0 : i32
    return %c0_i32, %c0_i32_0 : i32, i32
  }
  func.func @transform_3(%arg0: i32, %arg1: i32) -> (i32, i32) {
    %c0_i32 = arith.constant 0 : i32
    %c0_i32_0 = arith.constant 0 : i32
    return %arg0, %c0_i32 : i32, i32
  }
}

</mosaic_0001>

<bundles_post_ra>
// kernel: tpu_custom_call.1
= control target key start
LH: loop header
LB: loop body
LE: loop exit
PB: predicated region body
PF: predicated region fallthrough
CT: control target
= control target key end

     0   :  { %s2201_s0 = inlined_call_operand.hbm [shape: bf16[256,256], index: 0, kind: input, shape index: {}]   ;;  %s2202_s1 = inlined_call_operand.hbm [shape: bf16[256,256], index: 1, kind: input, shape index: {}]   ;;  %s2203_s2 = inlined_call_operand.hbm [shape: bf16[256,128], index: 2, kind: input, shape index: {}]   ;;  %s2204_s3 = inlined_call_operand.hbm [shape: f32[256,128], index: 3, kind: output, shape index: {}]  }
   0x1   :  { %2226 = sst [smem:[#allocation23_spill]] %s2203_s2 }
   0x2   :  { %2227 = sst [smem:[#allocation24_spill]] %s2204_s3 }
   0x3   :  { %8 = vsyncpa [#allocation4], 0 }
   0x4   :  { %10 = vsyncpa [#allocation4 + $0x1], 0 }
   0x5   :  { %11 = vsyncpa [#allocation7], 0 }
   0x6   :  { %13 = vsyncpa [#allocation7 + $0x1], 0 }
   0x7   :  { %14 = vsyncpa [#allocation5], 0 }
   0x8   :  { %16 = vsyncpa [#allocation5 + $0x1], 0  ;;  %s1765_s12 = smov 0   ;;  %s1767_s13 = smov 0  }
   0x9   :  { %s1769_s14 = smov 0   ;;  %s1771_s15 = smov 0  }
   0xa   :  { %s1773_s16 = smov 0   ;;  %s1775_s17 = smov 0  }
   0xb   :  { %s1777_s18 = smov 0   ;;  %s1779_s19 = smov 0  }
   0xc   :  { %s1781_s20 = smov 0   ;;  %s1783_s21 = smov 0  }
   0xd   :  { %s1785_s22 = smov 0   ;;  %s1787_s23 = smov 0  }
   0xe   :  { %s1789_s24 = smov 0   ;;  %s1791_s25 = smov 0  }
   0xf LB: > { %2228 = sst [smem:[#allocation14_spill]] %s1679_s12  ;;  %s1832_s26 = sadd.s32 4294967295, %s1731_s25   ;;  %s1731_s25 = sphi %s1791_s25, %s22_s25   ;;  %s1727_s24 = sphi %s1789_s24, %s2288_s24   ;;  %s1723_s23 = sphi %s1787_s23, %s2287_s23   ;;  %s1719_s22 = sphi %s1785_s22, %s2286_s22   ;;  %s1715_s21 = sphi %s1783_s21, %s2285_s21   ;;  %s1711_s20 = sphi %s1781_s20, %s2284_s20   ;;  %s1707_s19 = sphi %s1779_s19, %s2283_s19   ;;  %s1703_s18 = sphi %s1777_s18, %s2282_s18   ;;  %s1699_s17 = sphi %s1775_s17, %s2281_s17   ;;  %s1695_s16 = sphi %s1773_s16, %s2280_s16   ;;  %s1691_s15 = sphi %s1771_s15, %s2279_s15   ;;  %s1687_s14 = sphi %s1769_s14, %s2278_s14   ;;  %s1683_s13 = sphi %s1767_s13, %s2277_s13   ;;  %s1679_s12 = sphi %s1765_s12, %s2276_s12  }
  0x10   : > { %2229 = sst [smem:[#allocation15_spill]] %s1683_s13  ;;  %s1127_s27 = sadd.s32 4294967294, %s1731_s25  }
  0x11   : > { %2230 = sst [smem:[#allocation16_spill]] %s1715_s21  ;;  %p56_p0 = scmp.ne.s32.totalorder %s1707_s19, %s1703_s18 }
  0x12   : > { %2231 = sst [smem:[#allocation17_spill]] %s1719_s22  ;;  %p2206_p1 = scmp.eq.s32.totalorder %s1832_s26, 0 }
  0x13   : > { %2232 = sst [smem:[#allocation18_spill]] %s1832_s26  ;;  %p82_p2 = scmp.ne.s32.totalorder %s1695_s16, %s1691_s15 }
  0x14   : > { %p1841_p3 = por %p2206_p1, %p56_p0  ;;  %p126_p4 = scmp.ne.s32.totalorder %s1687_s14, %s1683_s13 }
  0x15   : > { %p1849_p5 = por %p82_p2, %p2206_p1  ;;  %p127_p6 = scmp.eq.s32.totalorder %s1832_s26, 3 }
  0x16   : > { %s2233_s29 = scalar_select %p1841_p3, 1, 0 }
  0x17   : > { %s2234_s30 = scalar_select %p1849_p5, 1, 0 }
  0x18   : > { %p132_p7 = scmp.ne.s32.totalorder %s1683_s13, %s1679_s12  ;;  %p133_p8 = scmp.eq.s32.totalorder %s1127_s27, 3 }
  0x19   : > { %2235 = sst [smem:[#allocation19_spill]] %s2234_s30  ;;  %p1856_p9 = por %p127_p6, %p126_p4 }
  0x1a   : > { %p1128_p10 = scmp.ge.s32.totalorder %s1731_s25, 1  ;;  %p1861_p11 = por %p133_p8, %p132_p7 }
  0x1b   : > { %s2236_s4 = scalar_select %p1856_p9, 1, 0 }
  0x1c   : > { %s2238_s5 = scalar_select %p1861_p11, 1, 0 }
  0x1d   : > { %2237 = sst [smem:[#allocation20_spill]] %s2236_s4  ;;  %p140_p12 = scmp.lt.s32.totalorder %s1731_s25, 5 }
  0x1e   : > { %2239 = sst [smem:[#allocation21_spill]] %s2238_s5  ;;  %s1733_s7 = smov [#allocation8]  }
  0x1f   : > { %p1866_p13 = pnand %p1128_p10, %p140_p12  ;;  %s152_s8 = sshll.u32 %s1733_s7, 4  ;;  %s153_s8 = int_to_ptr.vmem [resolvable:$true] %s152_s8 }
  0x20   : > { %s2242_s2 = sld [smem:[#allocation23_spill]] }
  0x21   : > { %s2240_s6 = scalar_select %p1866_p13, 1, 0 }
  0x22   : > { %p1301_p0 = pneg %p1866_p13 }
  0x24   : > { %p1874_p2 = pnand %p1301_p0, %p2206_p1 }
  0x26   : > { %s1489_s15 = scalar_lea.hbm %s2242_s2, 2048  ;;  %p1491_p6 = pneg %p1874_p2 }
  0x27   : > { %p1490_p4 = scmp.ne.s32.totalorder %s2242_s2, %s1489_s15  ;;  %p1496_p10 = scmp.lt.u32.totalorder %s1489_s15, %s2242_s2 }
  0x29   : > { %p1492_p7 = pnand %p1491_p6, %p1490_p4 }
  0x2b   : > { %p1493_p8 = pneg %p1492_p7 }
  0x2d   : > { %p1498_p12 = pnand %p1496_p10, %p1493_p8 }
  0x2f   : > { %1501 = shalt.err (!%p1498_p12)
}
  0x30   : > { %s1502_s5 = scalar_lea.vmem %s153_s8, 2048  ;;  %p1510_p9 = scmp.lt.s32.totalorder %s153_s8, %s153_s8 }
  0x31   : > { %p1503_p0 = scmp.ne.s32.totalorder %s153_s8, %s1502_s5  ;;  %p1511_p5 = scmp.lt.s32.totalorder %s1502_s5, %s1502_s5 }
  0x33   : > { %p1505_p1 = pnand %p1503_p0, %p1491_p6  ;;  %p1512_p3 = por %p1511_p5, %p1510_p9 }
  0x35   : > { %p1506_p11 = pneg %p1505_p1 }
  0x37   : > { %p1513_p13 = pnand %p1512_p3, %p1506_p11 }
  0x39   : > { %1516 = shalt.err (!%p1513_p13)
}
  0x3a   : > { %s2211_s10 = smov 64   ;;  %s2212_s28 = smov 4  }
  0x3b   : > { %1304 = dma.hbm_to_vmem [thread:$0]  (!%p1874_p2), %s2242_s2, 2048, %s153_s8, [#allocation7], %s2211_s10, %s2211_s10, %s2212_s28  }
  0x3c   : > { %s31_s15 = sadd.s32 1, %s1723_s23  ;;  %s34_s18 = sadd.s32 1, %s1727_s24 }
  0x3d   : > { %p32_p1 = scmp.ge.s32.totalorder %s31_s15, 2  ;;  %s43_s27 = sadd.s32 1, %s1711_s20 }
  0x3e   : > { %p50_p3 = scmp.ne.s32.totalorder %s1711_s20, %s1707_s19  ;;  %p2225_p5 = scmp.eq.s32.totalorder %s1731_s25, 0 }
  0x3f   : > { %s2290_s15 = smov (%p32_p1, %s31_s15), 0  ;;  %s2292_s18 = smov (!%p32_p1, %s34_s18), %s1727_s24 }
  0x40   : > { %2243 = sst [smem:[#allocation22_spill]] %s2290_s15  ;;  %s1907_s9 = ssub.s32 %s1723_s23, %s2290_s15 }
  0x41   : > { %p36_p9 = scmp.ge.s32.totalorder %s2292_s18, 2  ;;  %p67_p11 = scmp.eq.s32.totalorder %s1907_s9, 0 }
  0x42   : > { %p1913_p13 = por %p2225_p5, %p50_p3  ;;  %p2224_p2 = scmp.lt.s32.totalorder %s1731_s25, 4 }
  0x43   : > { %s2294_s18 = smov (%p36_p9, %s2292_s18), 0  ;;  %s166_s7 = sand.u32 1, %s1711_s20  }
  0x44   : > { %s1191_s5 = sshll.u32 %s1727_s24, 5  ;;  %s38_s11 = ssub.s32 %s1727_s24, %s2294_s18 }
  0x45   : > { %s40_s10 = sor.u32 %s1907_s9, %s38_s11  ;;  %p114_p4 = scmp.eq.s32.totalorder %s38_s11, 0 }
  0x46   : > { %p41_p6 = scmp.eq.s32.totalorder %s40_s10, 0  ;;  %s1131_s28 = sshll.u32 %s166_s7, 6 }
  0x47   : > { %s2245_s2 = sadd.s32 1, %s1687_s14  ;;  %s176_s3 = sadd.s32 %s1723_s23, %s1191_s5 }
  0x48   : > { %s1928_s15 = scalar_select %p114_p4, %s1687_s14, %s2245_s2  }
  0x49   : > { %s1931_s12 = scalar_select %p41_p6, %s1711_s20, %s43_s27  }
  0x4a   : > { %s1134_s4 = sshll.u32 %s176_s3, 6  ;;  %s170_s22 = scalar_lea.vmem [#allocation3], %s1131_s28 }
  0x4b   : > { %s179_s21 = sshll.u32 %s170_s22, 4  ;;  %s1937_s26 = scalar_lea.hbm %s2201_s0, %s1134_s4  ;;  %s1939_s21 = int_to_ptr.vmem [resolvable:$true] %s179_s21 }
  0x4c   : > { %p1945_p7 = pnand %p2224_p2, %p1913_p13  ;;  %s189_s3 = sand.u32 1, %s1731_s25  }
  0x4d   : > { %s1950_s22 = scalar_lea.sflag [#allocation4], %s166_s7  ;;  %s1517_s13 = scalar_lea.hbm %s1937_s26, 1024 }
  0x4e   : > { %p1518_p8 = scmp.ne.s32.totalorder %s1937_s26, %s1517_s13  ;;  %p1519_p10 = pneg %p1945_p7 }
  0x4f   : > { %s1522_s10 = scalar_lea.hbm %s2201_s0, 4096  ;;  %p1523_p1 = scmp.lt.u32.totalorder %s1937_s26, %s2201_s0 }
  0x50   : > { %p1520_p12 = pnand %p1519_p10, %p1518_p8  ;;  %p1524_p3 = scmp.lt.u32.totalorder %s1522_s10, %s1517_s13 }
  0x51   : > { %p1526_p13 = scmp.lt.u32.totalorder %s1517_s13, %s1937_s26 }
  0x52   : > { %p1521_p0 = pneg %p1520_p12  ;;  %p1525_p9 = por %p1524_p3, %p1523_p1 }
  0x54   : > { %p1527_p4 = por %p1526_p13, %p1525_p9 }
  0x56   : > { %p1528_p6 = pnand %p1527_p4, %p1521_p0 }
  0x58   : > { %1531 = shalt.err (!%p1528_p6)
}
  0x59   : > { %s1532_s8 = scalar_lea.vmem %s1939_s21, 1024  ;;  %s1736_s7 = smov [#allocation3]  }
  0x5a   : > { %p1533_p8 = scmp.ne.s32.totalorder %s1939_s21, %s1532_s8  ;;  %s1537_s5 = sshll.u32 %s1736_s7, 4  ;;  %s1538_s5 = int_to_ptr.vmem [resolvable:$false] %s1537_s5 }
  0x5b   : > { %s1539_s11 = scalar_lea.vmem %s1538_s5, 2048  ;;  %p1540_p5 = scmp.lt.s32.totalorder %s1939_s21, %s1538_s5 }
  0x5c   : > { %p1535_p12 = pnand %p1533_p8, %p1519_p10  ;;  %p1541_p1 = scmp.lt.s32.totalorder %s1539_s11, %s1532_s8 }
  0x5e   : > { %p1536_p2 = pneg %p1535_p12  ;;  %p1542_p3 = por %p1541_p1, %p1540_p5 }
  0x60   : > { %p1543_p9 = pnand %p1542_p3, %p1536_p2 }
  0x62   : > { %1546 = shalt.err (!%p1543_p9)
}
  0x63   : > { %s1737_s13 = smov 128   ;;  %s2247_s30 = smov 4  }
  0x64   : > { %s2248_s4 = smov 64   ;;  %s69_s10 = sadd.s32 1, %s1699_s17 }
  0x65   : > { %1308 = dma.hbm_to_vmem [thread:$0]  (!%p1945_p7), %s1937_s26, 1024, %s1939_s21, %s1950_s22, %s1737_s13, %s2248_s4, %s2247_s30  }
  0x66   : > { %p76_p5 = scmp.ne.s32.totalorder %s1699_s17, %s1695_s16  ;;  %p2249_p2 = scmp.eq.s32.totalorder %s1731_s25, 0 }
  0x67   : > { %s1987_s2 = scalar_select %p67_p11, %s1699_s17, %s69_s10  }
  0x68   : > { %p78_p10 = por %p76_p5, %p2249_p2  ;;  %s191_s28 = sand.u32 1, %s1699_s17  }
  0x69   : > { %s1193_s27 = sshll.u32 %s1723_s23, 11  ;;  %s1135_s8 = sshll.u32 %s191_s28, 7 }
  0x6a   : > { %s1996_s11 = scalar_lea.hbm %s2202_s1, %s1193_s27  ;;  %p2250_p0 = scmp.lt.s32.totalorder %s1731_s25, 4 }
  0x6b   : > { %s193_s26 = scalar_lea.vmem [#allocation6], %s1135_s8  ;;  %s2008_s22 = scalar_lea.sflag [#allocation7], %s189_s3 }
  0x6c   : > { %p2000_p7 = pnand %p2250_p0, %p78_p10  ;;  %s201_s9 = sshll.u32 %s193_s26, 4  ;;  %s2004_s9 = int_to_ptr.vmem [resolvable:$true] %s201_s9 }
  0x6d   : > { %s1547_s30 = scalar_lea.hbm %s1996_s11, 2048  ;;  %s1552_s28 = scalar_lea.hbm %s2202_s1, 4096 }
  0x6e   : > { %p1548_p11 = scmp.ne.s32.totalorder %s1996_s11, %s1547_s30  ;;  %p1549_p13 = pneg %p2000_p7 }
  0x6f   : > { %p1553_p8 = scmp.lt.u32.totalorder %s1996_s11, %s2202_s1  ;;  %p1554_p12 = scmp.lt.u32.totalorder %s1552_s28, %s1547_s30 }
  0x70   : > { %p1550_p4 = pnand %p1549_p13, %p1548_p11  ;;  %p1556_p3 = scmp.lt.u32.totalorder %s1547_s30, %s1996_s11 }
  0x71   : > { %p1555_p1 = por %p1554_p12, %p1553_p8 }
  0x72   : > { %p1551_p6 = pneg %p1550_p4 }
  0x73   : > { %p1557_p9 = por %p1556_p3, %p1555_p1 }
  0x75   : > { %p1558_p5 = pnand %p1557_p9, %p1551_p6 }
  0x77   : > { %1561 = shalt.err (!%p1558_p5)
}
  0x78   : > { %s1562_s3 = scalar_lea.vmem %s2004_s9, 2048  ;;  %s1738_s7 = smov [#allocation6]  }
  0x79   : > { %p1563_p2 = scmp.ne.s32.totalorder %s2004_s9, %s1562_s3  ;;  %s1567_s5 = sshll.u32 %s1738_s7, 4  ;;  %s1568_s5 = int_to_ptr.vmem [resolvable:$false] %s1567_s5 }
  0x7a   : > { %s1569_s26 = scalar_lea.vmem %s1568_s5, 4096  ;;  %p1570_p11 = scmp.lt.s32.totalorder %s2004_s9, %s1568_s5 }
  0x7b   : > { %p1565_p10 = pnand %p1563_p2, %p1549_p13  ;;  %p1571_p4 = scmp.lt.s32.totalorder %s1569_s26, %s1562_s3 }
  0x7d   : > { %p1566_p0 = pneg %p1565_p10  ;;  %p1572_p8 = por %p1571_p4, %p1570_p11 }
  0x7f   : > { %p1573_p12 = pnand %p1572_p8, %p1566_p0 }
  0x81   : > { %1576 = shalt.err (!%p1573_p12)
}
  0x82   : > { %s1739_s30 = smov 8   ;;  %p2252_p13 = scmp.ne.s32.totalorder %s2240_s6, 0 }
  0x83   : > { %1311 = dma.hbm_to_vmem [thread:$0]  (!%p2000_p7), %s1996_s11, 2048, %s2004_s9, %s2008_s22, %s1737_s13, %s1737_s13, %s1739_s30  }
  0x84   : > { %213 = sbr.rel (%p2252_p13) target bundleno = 735 (0x2df), region = 32  ;;  %s215_s4 = sand.u32 (!%p2252_p13), 1, %s1707_s19  }
  0x85   : > { %s1140_s10 = sshll.u32 (!%p2252_p13), %s215_s4, 6  ;;  %s216_s28 = scalar_lea.sflag (!%p2252_p13), [#allocation4], %s215_s4 }
  0x86   : > { %s2041_s27 = scalar_lea.vmem (!%p2252_p13), [#allocation3], %s1140_s10  ;;  %p2253_p6 = scmp.ne.s32.totalorder (!%p2252_p13), %s2233_s29, 0 }
  0x8b   : > { %1662 = dma.done.wait (%p2253_p6), %s216_s28, 1024  }
  0x8c   : > { %1664 = vsyncadd (%p2253_p6), %s216_s28, 4294966272  ;;  %s2254_s21 = sld [smem:[#allocation18_spill]]  ;;  %s2255_s8 = sld [smem:[#allocation19_spill]] }
  0x8d   : > { %s226_s13 = sand.u32 1, %s1695_s16  }
  0x8e   : > { %s1141_s11 = sshll.u32 %s226_s13, 7 }
  0x8f   : > { %s2049_s9 = scalar_lea.vmem [#allocation6], %s1141_s11 }
  0x92   : > { %s224_s3 = sand.u32 1, %s2254_s21   ;;  %p2256_p7 = scmp.ne.s32.totalorder %s2255_s8, 0 }
  0x93   : > { %s225_s6 = scalar_lea.sflag [#allocation7], %s224_s3 }
  0x94   : > { %1666 = dma.done.wait (%p2256_p7), %s225_s6, 2048  }
  0x95   : > { %1668 = vsyncadd (%p2256_p7), %s225_s6, 4294965248  ;;  %p2257_p1 = scmp.eq.s32.totalorder %s2254_s21, 0 }
  0x97   : > { %1670 = dma.done.wait (%p2257_p1), [#allocation7], 2048   ;;  %p2258_p3 = pmov %p2257_p1 }
  0x98   : > { %s2259_s29 = sld [smem:[#allocation15_spill]]  ;;  %s2260_s26 = sld [smem:[#allocation16_spill]] }
  0x99   : > { %1672 = vsyncadd (%p2258_p3), [#allocation7], 4294965248 }
  0x9e   : > { %s257_s22 = sand.u32 1, %s2259_s29   ;;  %p1144_p9 = scmp.ne.s32.totalorder %s2260_s26, 0 }
  0x9f   : > { %s1143_s7 = sshll.u32 %s257_s22, 7  ;;  %v1740_v0 = vmov (!%p1144_p9), 0.0  }
  0xa0   : > { %s2062_s5 = scalar_lea.vmem [#allocation9], %s1143_s7  ;;  %267 = sbr.rel (%p1144_p9) target bundleno = 176 (0xb0), region = 48  ;;  %268 = vst [vmem:[#allocation2] sm:$0xff] (!%p1144_p9), %v1740_v0  ;;  %269 = vst [vmem:[#allocation2 + $0x8] sm:$0xff] (!%p1144_p9), %v1740_v0 }
  0xa1   : > { %270 = vst [vmem:[#allocation2 + $0x10] sm:$0xff] (!%p1144_p9), %v1740_v0  ;;  %271 = vst [vmem:[#allocation2 + $0x18] sm:$0xff] (!%p1144_p9), %v1740_v0 }
  0xa2   : > { %272 = vst [vmem:[#allocation2 + $0x20] sm:$0xff] (!%p1144_p9), %v1740_v0  ;;  %273 = vst [vmem:[#allocation2 + $0x28] sm:$0xff] (!%p1144_p9), %v1740_v0 }
  0xa3   : > { %274 = vst [vmem:[#allocation2 + $0x30] sm:$0xff] (!%p1144_p9), %v1740_v0  ;;  %275 = vst [vmem:[#allocation2 + $0x38] sm:$0xff] (!%p1144_p9), %v1740_v0 }
  0xa4   : > { %276 = vst [vmem:[#allocation2 + $0x40] sm:$0xff] (!%p1144_p9), %v1740_v0  ;;  %277 = vst [vmem:[#allocation2 + $0x48] sm:$0xff] (!%p1144_p9), %v1740_v0 }
  0xa5   : > { %278 = vst [vmem:[#allocation2 + $0x50] sm:$0xff] (!%p1144_p9), %v1740_v0  ;;  %279 = vst [vmem:[#allocation2 + $0x58] sm:$0xff] (!%p1144_p9), %v1740_v0 }
  0xa6   : > { %280 = vst [vmem:[#allocation2 + $0x60] sm:$0xff] (!%p1144_p9), %v1740_v0  ;;  %281 = vst [vmem:[#allocation2 + $0x68] sm:$0xff] (!%p1144_p9), %v1740_v0 }
  0xa7   : > { %282 = vst [vmem:[#allocation2 + $0x70] sm:$0xff] %v1740_v0  ;;  %283 = vst [vmem:[#allocation2 + $0x78] sm:$0xff] %v1740_v0 }
  0xa8   : > { %284 = vst [vmem:[#allocation2 + $0x80] sm:$0xff] %v1740_v0  ;;  %285 = vst [vmem:[#allocation2 + $0x88] sm:$0xff] %v1740_v0 }
  0xa9   : > { %286 = vst [vmem:[#allocation2 + $0x90] sm:$0xff] %v1740_v0  ;;  %287 = vst [vmem:[#allocation2 + $0x98] sm:$0xff] %v1740_v0 }
  0xaa   : > { %288 = vst [vmem:[#allocation2 + $0xa0] sm:$0xff] %v1740_v0  ;;  %289 = vst [vmem:[#allocation2 + $0xa8] sm:$0xff] %v1740_v0 }
  0xab   : > { %290 = vst [vmem:[#allocation2 + $0xb0] sm:$0xff] %v1740_v0  ;;  %291 = vst [vmem:[#allocation2 + $0xb8] sm:$0xff] %v1740_v0 }
  0xac   : > { %292 = vst [vmem:[#allocation2 + $0xc0] sm:$0xff] %v1740_v0  ;;  %293 = vst [vmem:[#allocation2 + $0xc8] sm:$0xff] %v1740_v0 }
  0xad   : > { %294 = vst [vmem:[#allocation2 + $0xd0] sm:$0xff] %v1740_v0  ;;  %295 = vst [vmem:[#allocation2 + $0xd8] sm:$0xff] %v1740_v0 }
  0xae   : > { %296 = vst [vmem:[#allocation2 + $0xe0] sm:$0xff] %v1740_v0  ;;  %297 = vst [vmem:[#allocation2 + $0xe8] sm:$0xff] %v1740_v0 }
  0xaf   : > { %298 = vst [vmem:[#allocation2 + $0xf0] sm:$0xff] %v1740_v0  ;;  %299 = vst [vmem:[#allocation2 + $0xf8] sm:$0xff] %v1740_v0 }
  0xb0 PF: > { %v1441_v1 = vld [vmem:[%s2049_s9 + $0x4] ss:$8 sps:$4 sm:$0xff]   ;;  %v1443_v2 = vld [vmem:[%s2049_s9] ss:$8 sps:$4 sm:$0xff]   ;;  %v1741_v3 = vmov 0   ;;  %v1469_v22 = vld [vmem:[%s2041_s27 + $0x10] sm:$0xff]  }
  0xb1   : > { %524 = vmatprep.mubr.bf16.mxu0 %v1741_v3  ;;  %564 = vmatprep.mubr.bf16.mxu1 %v1741_v3  ;;  %v1444_v4 = vld [vmem:[%s2049_s9 + $0x14] ss:$8 sps:$4 sm:$0xff]   ;;  %v1446_v5 = vld [vmem:[%s2049_s9 + $0x10] ss:$8 sps:$4 sm:$0xff]   ;;  %v1447_v6 = vld [vmem:[%s2049_s9 + $0x24] ss:$8 sps:$4 sm:$0xff]  }
  0xb2   : > { %492 = vmatprep.subr.bf16.mxu0 %v1441_v1  ;;  %1259 = vmatprep.subr.bf16.mxu1 %v1441_v1  ;;  %v1449_v7 = vld [vmem:[%s2049_s9 + $0x20] ss:$8 sps:$4 sm:$0xff]   ;;  %v1450_v8 = vld [vmem:[%s2049_s9 + $0x34] ss:$8 sps:$4 sm:$0xff]   ;;  %v1452_v9 = vld [vmem:[%s2049_s9 + $0x30] ss:$8 sps:$4 sm:$0xff]  }
  0xb3   : > { %493 = vmatpush1.bf16.msra.mxu0 %v1443_v2  ;;  %1267 = vmatpush1.bf16.msra.mxu1 %v1443_v2  ;;  %v1453_v10 = vld [vmem:[%s2049_s9 + $0x44] ss:$8 sps:$4 sm:$0xff]   ;;  %v1455_v11 = vld [vmem:[%s2049_s9 + $0x40] ss:$8 sps:$4 sm:$0xff]   ;;  %v1456_v12 = vld [vmem:[%s2049_s9 + $0x54] ss:$8 sps:$4 sm:$0xff]  }
  0xb4   : > { %494 = vmatprep.subr.bf16.mxu0 %v1444_v4  ;;  %1260 = vmatprep.subr.bf16.mxu1 %v1444_v4  ;;  %v1458_v13 = vld [vmem:[%s2049_s9 + $0x50] ss:$8 sps:$4 sm:$0xff]   ;;  %v1459_v14 = vld [vmem:[%s2049_s9 + $0x64] ss:$8 sps:$4 sm:$0xff]   ;;  %v1461_v15 = vld [vmem:[%s2049_s9 + $0x60] ss:$8 sps:$4 sm:$0xff]  }
  0xb5   : > { %v1462_v16 = vld [vmem:[%s2049_s9 + $0x74] ss:$8 sps:$4 sm:$0xff]   ;;  %v1464_v17 = vld [vmem:[%s2049_s9 + $0x70] ss:$8 sps:$4 sm:$0xff]   ;;  %v1465_v18 = vld [vmem:[%s2041_s27] sm:$0xff]   ;;  %s2261_s30 = sld [smem:[#allocation16_spill]] }
  0xb6   : > { %v1466_v19 = vld [vmem:[%s2041_s27 + $0x20] sm:$0xff]   ;;  %v1467_v20 = vld [vmem:[%s2041_s27 + $0x8] sm:$0xff]   ;;  %v1470_v23 = vld [vmem:[%s2041_s27 + $0x30] sm:$0xff]  }
  0xb7   : > { %495 = vmatpush1.bf16.msra.mxu0 %v1446_v5  ;;  %1268 = vmatpush1.bf16.msra.mxu1 %v1446_v5  ;;  %v1468_v21 = vld [vmem:[%s2041_s27 + $0x28] sm:$0xff]   ;;  %v1471_v24 = vld [vmem:[%s2041_s27 + $0x18] sm:$0xff]   ;;  %v300_v26 = vld [vmem:[#allocation2] sm:$0xff] }
  0xb8   : > { %496 = vmatprep.subr.bf16.mxu0 %v1447_v6  ;;  %1261 = vmatprep.subr.bf16.mxu1 %v1447_v6  ;;  %v1472_v25 = vld [vmem:[%s2041_s27 + $0x38] sm:$0xff]   ;;  %v316_v27 = vld [vmem:[#allocation2 + $0x80] sm:$0xff]  ;;  %v301_v28 = vld [vmem:[#allocation2 + $0x8] sm:$0xff] }
  0xb9   : > { %v317_v29 = vld [vmem:[#allocation2 + $0x88] sm:$0xff]  ;;  %v302_v32 = vld [vmem:[#allocation2 + $0x10] sm:$0xff]  ;;  %v303_v38 = vld [vmem:[#allocation2 + $0x18] sm:$0xff] }
  0xba   : > { %v318_v33 = vld [vmem:[#allocation2 + $0x90] sm:$0xff]  ;;  %v319_v39 = vld [vmem:[#allocation2 + $0x98] sm:$0xff]  ;;  %v304_v50 = vld [vmem:[#allocation2 + $0x20] sm:$0xff] }
  0xbb   : > { %497 = vmatpush1.bf16.msra.mxu0 %v1449_v7  ;;  %1269 = vmatpush1.bf16.msra.mxu1 %v1449_v7  ;;  %v320_v51 = vld [vmem:[#allocation2 + $0xa0] sm:$0xff]  ;;  %v305_v52 = vld [vmem:[#allocation2 + $0x28] sm:$0xff]  ;;  %v306_v56 = vld [vmem:[#allocation2 + $0x30] sm:$0xff]  ;;  %p1169_p5 = scmp.ne.s32.totalorder %s2261_s30, 1 }
  0xbc   : > { %498 = vmatprep.subr.bf16.mxu0 %v1450_v8  ;;  %1262 = vmatprep.subr.bf16.mxu1 %v1450_v8  ;;  %v321_v53 = vld [vmem:[#allocation2 + $0xa8] sm:$0xff]  ;;  %v322_v57 = vld [vmem:[#allocation2 + $0xb0] sm:$0xff]  ;;  %v307_v62 = vld [vmem:[#allocation2 + $0x38] sm:$0xff] }
  0xbd   : > { %v323_v63 = vld [vmem:[#allocation2 + $0xb8] sm:$0xff] }
  0xbf   : > { %499 = vmatpush1.bf16.msra.mxu0 %v1452_v9  ;;  %1270 = vmatpush1.bf16.msra.mxu1 %v1452_v9 }
  0xc0   : > { %500 = vmatprep.subr.bf16.mxu0 %v1453_v10  ;;  %1263 = vmatprep.subr.bf16.mxu1 %v1453_v10  ;;  %v308_v10 = vld [vmem:[#allocation2 + $0x40] sm:$0xff] }
  0xc3   : > { %501 = vmatpush1.bf16.msra.mxu0 %v1455_v11  ;;  %1271 = vmatpush1.bf16.msra.mxu1 %v1455_v11  ;;  %v324_v11 = vld [vmem:[#allocation2 + $0xc0] sm:$0xff] }
  0xc4   : > { %502 = vmatprep.subr.bf16.mxu0 %v1456_v12  ;;  %1264 = vmatprep.subr.bf16.mxu1 %v1456_v12  ;;  %v309_v12 = vld [vmem:[#allocation2 + $0x48] sm:$0xff] }
  0xc7   : > { %503 = vmatpush1.bf16.msra.mxu0 %v1458_v13  ;;  %1272 = vmatpush1.bf16.msra.mxu1 %v1458_v13  ;;  %v325_v13 = vld [vmem:[#allocation2 + $0xc8] sm:$0xff] }
  0xc8   : > { %504 = vmatprep.subr.bf16.mxu0 %v1459_v14  ;;  %1265 = vmatprep.subr.bf16.mxu1 %v1459_v14 }
  0xcb   : > { %505 = vmatpush1.bf16.msra.mxu0 %v1461_v15  ;;  %1273 = vmatpush1.bf16.msra.mxu1 %v1461_v15 }
  0xcc   : > { %506 = vmatprep.subr.bf16.mxu0 %v1462_v16  ;;  %1266 = vmatprep.subr.bf16.mxu1 %v1462_v16  ;;  %v310_v16 = vld [vmem:[#allocation2 + $0x50] sm:$0xff] }
  0xcf   : > { %507 = vmatpush1.bf16.msra.mxu0 %v1464_v17  ;;  %1274 = vmatpush1.bf16.msra.mxu1 %v1464_v17  ;;  %v326_v17 = vld [vmem:[#allocation2 + $0xd0] sm:$0xff] }
  0xd2   : > { %525 = vmatmul.mubr.bf16.vlgmr.msra.gmra.mrb[0].mxu0 %v1465_v18  ;;  %565 = vmatmul.mubr.bf16.vlgmr.msra.gmra.mrb[0].mxu1 %v1466_v19 }
  0xd3   : > { %534 = vmatprep.mubr.bf16.mxu0 %v1741_v3  ;;  %574 = vmatprep.mubr.bf16.mxu1 %v1741_v3 }
  0xda   : > { %535 = vmatmul.mubr.bf16.gmra.mrb[4].mxu0 %v1467_v20  ;;  %575 = vmatmul.mubr.bf16.gmra.mrb[4].mxu1 %v1468_v21 }
  0xdb   : > { %544 = vmatprep.mubr.bf16.mxu0 %v1741_v3  ;;  %584 = vmatprep.mubr.bf16.mxu1 %v1741_v3 }
  0xe2   : > { %545 = vmatmul.mubr.bf16.gmra.mrb[8].mxu0 %v1469_v22  ;;  %585 = vmatmul.mubr.bf16.gmra.mrb[8].mxu1 %v1470_v23  ;;  %v311_v22 = vld [vmem:[#allocation2 + $0x58] sm:$0xff] }
  0xe3   : > { %554 = vmatprep.mubr.bf16.mxu0 %v1741_v3  ;;  %594 = vmatprep.mubr.bf16.mxu1 %v1741_v3  ;;  %v327_v23 = vld [vmem:[#allocation2 + $0xd8] sm:$0xff] }
  0xea   : > { %555 = vmatmul.mubr.bf16.gmra.mrb[12].mxu0 %v1471_v24  ;;  %595 = vmatmul.mubr.bf16.gmra.mrb[12].mxu1 %v1472_v25 }
 0x1a5   : > { %v526_v30 = vpop.f32.mrb[0].mxu0  ;;  %v566_v31 = vpop.f32.mrb[0].mxu1 }
 0x1a6   : > { %v605_v34 = vadd.f32 %v526_v30, %v300_v26  ;;  %v621_v35 = vadd.f32 %v566_v31, %v316_v27  ;;  %v528_v36 = vpop.f32.mrb[1].mxu0  ;;  %v568_v37 = vpop.f32.mrb[1].mxu1 }
 0x1a7   : > { %v606_v40 = vadd.f32 %v528_v36, %v301_v28  ;;  %v622_v41 = vadd.f32 %v568_v37, %v317_v29  ;;  %v530_v42 = vpop.f32.mrb[2].mxu0  ;;  %v570_v43 = vpop.f32.mrb[2].mxu1  ;;  %v313_v36 = vld [vmem:[#allocation2 + $0x68] sm:$0xff] }
 0x1a8   : > { %637 = vst [vmem:[#allocation2] sm:$0xff] %v605_v34  ;;  %653 = vst [vmem:[#allocation2 + $0x80] sm:$0xff] %v621_v35  ;;  %v607_v44 = vadd.f32 %v530_v42, %v302_v32  ;;  %v623_v45 = vadd.f32 %v570_v43, %v318_v33  ;;  %v532_v46 = vpop.f32.mrb[3].mxu0  ;;  %v572_v47 = vpop.f32.mrb[3].mxu1  ;;  %v312_v34 = vld [vmem:[#allocation2 + $0x60] sm:$0xff]  ;;  %v329_v37 = vld [vmem:[#allocation2 + $0xe8] sm:$0xff] }
 0x1a9   : > { %638 = vst [vmem:[#allocation2 + $0x8] sm:$0xff] %v606_v40  ;;  %654 = vst [vmem:[#allocation2 + $0x88] sm:$0xff] %v622_v41  ;;  %v608_v48 = vadd.f32 %v532_v46, %v303_v38  ;;  %v624_v49 = vadd.f32 %v572_v47, %v319_v39  ;;  %v328_v35 = vld [vmem:[#allocation2 + $0xe0] sm:$0xff]  ;;  %v314_v40 = vld [vmem:[#allocation2 + $0x70] sm:$0xff] }
 0x1aa   : > { %639 = vst [vmem:[#allocation2 + $0x10] sm:$0xff] %v607_v44  ;;  %655 = vst [vmem:[#allocation2 + $0x90] sm:$0xff] %v623_v45  ;;  %v330_v41 = vld [vmem:[#allocation2 + $0xf0] sm:$0xff]  ;;  %v315_v46 = vld [vmem:[#allocation2 + $0x78] sm:$0xff] }
 0x1ab   : > { %640 = vst [vmem:[#allocation2 + $0x18] sm:$0xff] %v608_v48  ;;  %656 = vst [vmem:[#allocation2 + $0x98] sm:$0xff] %v624_v49  ;;  %v331_v47 = vld [vmem:[#allocation2 + $0xf8] sm:$0xff] }
 0x1ad   : > { %v536_v54 = vpop.f32.mrb[4].mxu0  ;;  %v576_v55 = vpop.f32.mrb[4].mxu1 }
 0x1ae   : > { %v609_v58 = vadd.f32 %v536_v54, %v304_v50  ;;  %v625_v59 = vadd.f32 %v576_v55, %v320_v51  ;;  %v538_v60 = vpop.f32.mrb[5].mxu0  ;;  %v578_v61 = vpop.f32.mrb[5].mxu1 }
 0x1af   : > { %v610_v0 = vadd.f32 %v538_v60, %v305_v52  ;;  %v626_v1 = vadd.f32 %v578_v61, %v321_v53  ;;  %v540_v2 = vpop.f32.mrb[6].mxu0  ;;  %v580_v3 = vpop.f32.mrb[6].mxu1  ;;  %v1475_v60 = vld [vmem:[#allocation8 + $0x48] sm:$0xff] (!%p1169_p5)  }
 0x1b0   : > { %641 = vst [vmem:[#allocation2 + $0x20] sm:$0xff] %v609_v58  ;;  %657 = vst [vmem:[#allocation2 + $0xa0] sm:$0xff] %v625_v59  ;;  %v611_v4 = vadd.f32 %v540_v2, %v306_v56  ;;  %v627_v5 = vadd.f32 %v580_v3, %v322_v57  ;;  %v542_v6 = vpop.f32.mrb[7].mxu0  ;;  %v582_v7 = vpop.f32.mrb[7].mxu1  ;;  %v1473_v58 = vld [vmem:[#allocation8 + $0x40] sm:$0xff] (!%p1169_p5)   ;;  %v1476_v61 = vld [vmem:[#allocation8 + $0x8] sm:$0xff] (!%p1169_p5)  }
 0x1b1   : > { %642 = vst [vmem:[#allocation2 + $0x28] sm:$0xff] %v610_v0  ;;  %658 = vst [vmem:[#allocation2 + $0xa8] sm:$0xff] %v626_v1  ;;  %v612_v8 = vadd.f32 %v542_v6, %v307_v62  ;;  %v628_v9 = vadd.f32 %v582_v7, %v323_v63  ;;  %v1474_v59 = vld [vmem:[#allocation8] sm:$0xff] (!%p1169_p5)   ;;  %1195 = vmatprep.subr.bf16.mxu0 (!%p1169_p5), %v1473_v58  ;;  %1275 = vmatprep.subr.bf16.mxu1 (!%p1169_p5), %v1473_v58  ;;  %v1477_v62 = vld [vmem:[#allocation8 + $0x50] sm:$0xff] (!%p1169_p5)  }
 0x1b2   : > { %643 = vst [vmem:[#allocation2 + $0x30] sm:$0xff] %v611_v4  ;;  %659 = vst [vmem:[#allocation2 + $0xb0] sm:$0xff] %v627_v5  ;;  %1196 = vmatpush3.bf16.msra.mxu0 (!%p1169_p5), %v1474_v59  ;;  %1283 = vmatpush3.bf16.msra.mxu1 (!%p1169_p5), %v1474_v59  ;;  %v1478_v63 = vld [vmem:[#allocation8 + $0x10] sm:$0xff] (!%p1169_p5)   ;;  %v1479_v0 = vld [vmem:[#allocation8 + $0x58] sm:$0xff] (!%p1169_p5)  }
 0x1b3   : > { %644 = vst [vmem:[#allocation2 + $0x38] sm:$0xff] %v612_v8  ;;  %660 = vst [vmem:[#allocation2 + $0xb8] sm:$0xff] %v628_v9  ;;  %1197 = vmatprep.subr.bf16.mxu0 (!%p1169_p5), %v1475_v60  ;;  %1276 = vmatprep.subr.bf16.mxu1 (!%p1169_p5), %v1475_v60  ;;  %v1480_v1 = vld [vmem:[#allocation8 + $0x18] sm:$0xff] (!%p1169_p5)   ;;  %v1481_v2 = vld [vmem:[#allocation8 + $0x60] sm:$0xff] (!%p1169_p5)  }
 0x1b4   : > { %v1482_v3 = vld [vmem:[#allocation8 + $0x20] sm:$0xff] (!%p1169_p5)   ;;  %v1483_v4 = vld [vmem:[#allocation8 + $0x68] sm:$0xff] (!%p1169_p5)   ;;  %v676_v6 = vld [vmem:[#allocation2 + $0x18] sm:$0xff] (!%p1169_p5) }
 0x1b5   : > { %v546_v14 = vpop.f32.mrb[8].mxu0  ;;  %v586_v15 = vpop.f32.mrb[8].mxu1  ;;  %v674_v5 = vld [vmem:[#allocation2 + $0x8] sm:$0xff] (!%p1169_p5)  ;;  %v708_v9 = vmax.f32 (!%p1169_p5), %v676_v6, 0.0 }
 0x1b6   : > { %v613_v18 = vadd.f32 %v546_v14, %v308_v10  ;;  %v629_v19 = vadd.f32 %v586_v15, %v324_v11  ;;  %v548_v20 = vpop.f32.mrb[9].mxu0  ;;  %v588_v21 = vpop.f32.mrb[9].mxu1  ;;  %1198 = vmatpush3.bf16.msra.mxu0 (!%p1169_p5), %v1476_v61  ;;  %1284 = vmatpush3.bf16.msra.mxu1 (!%p1169_p5), %v1476_v61  ;;  %v690_v7 = vld [vmem:[#allocation2 + $0x88] sm:$0xff] (!%p1169_p5)  ;;  %v706_v8 = vmax.f32 (!%p1169_p5), %v674_v5, 0.0  ;;  %v692_v10 = vld [vmem:[#allocation2 + $0x98] sm:$0xff] (!%p1169_p5)  ;;  %v1485_v15 = vld [vmem:[#allocation8 + $0x70] sm:$0xff] (!%p1169_p5)  }
 0x1b7   : > { %v614_v24 = vadd.f32 %v548_v20, %v309_v12  ;;  %v630_v25 = vadd.f32 %v588_v21, %v325_v13  ;;  %v550_v26 = vpop.f32.mrb[10].mxu0  ;;  %v590_v27 = vpop.f32.mrb[10].mxu1  ;;  %1199 = vmatprep.subr.bf16.mxu0 (!%p1169_p5), %v1477_v62  ;;  %1277 = vmatprep.subr.bf16.mxu1 (!%p1169_p5), %v1477_v62  ;;  %v722_v11 = vmax.f32 (!%p1169_p5), %v690_v7, 0.0  ;;  %v724_v12 = vmax.f32 (!%p1169_p5), %v692_v10, 0.0  ;;  %v1484_v13 = vld [vmem:[#allocation8 + $0x28] sm:$0xff] (!%p1169_p5)   ;;  %v675_v20 = vld [vmem:[#allocation2 + $0x10] sm:$0xff] (!%p1169_p5) }
 0x1b8   : > { %645 = vst [vmem:[#allocation2 + $0x40] sm:$0xff] %v613_v18  ;;  %661 = vst [vmem:[#allocation2 + $0xc0] sm:$0xff] %v629_v19  ;;  %v615_v28 = vadd.f32 %v550_v26, %v310_v16  ;;  %v631_v29 = vadd.f32 %v590_v27, %v326_v17  ;;  %v552_v30 = vpop.f32.mrb[11].mxu0  ;;  %v592_v31 = vpop.f32.mrb[11].mxu1  ;;  %v738_v14 = vpack.c.bf16 (!%p1169_p5), %v708_v9, %v706_v8  ;;  %v1486_v17 = vld [vmem:[#allocation8 + $0x30] sm:$0xff] (!%p1169_p5)   ;;  %v1487_v18 = vld [vmem:[#allocation8 + $0x78] sm:$0xff] (!%p1169_p5)  }
 0x1b9   : > { %646 = vst [vmem:[#allocation2 + $0x48] sm:$0xff] %v614_v24  ;;  %662 = vst [vmem:[#allocation2 + $0xc8] sm:$0xff] %v630_v25  ;;  %v616_v32 = vadd.f32 %v552_v30, %v311_v22  ;;  %v632_v33 = vadd.f32 %v592_v31, %v327_v23  ;;  %v746_v16 = vpack.c.bf16 (!%p1169_p5), %v724_v12, %v722_v11  ;;  %v673_v19 = vld [vmem:[#allocation2] sm:$0xff] (!%p1169_p5)  ;;  %v691_v22 = vld [vmem:[#allocation2 + $0x90] sm:$0xff] (!%p1169_p5) }
 0x1ba   : > { %647 = vst [vmem:[#allocation2 + $0x50] sm:$0xff] %v615_v28  ;;  %663 = vst [vmem:[#allocation2 + $0xd0] sm:$0xff] %v631_v29  ;;  %1200 = vmatpush3.bf16.msra.mxu0 (!%p1169_p5), %v1478_v63  ;;  %1285 = vmatpush3.bf16.msra.mxu1 (!%p1169_p5), %v1478_v63  ;;  %v689_v21 = vld [vmem:[#allocation2 + $0x80] sm:$0xff] (!%p1169_p5)  ;;  %v678_v23 = vld [vmem:[#allocation2 + $0x28] sm:$0xff] (!%p1169_p5)  ;;  %v705_v27 = vmax.f32 (!%p1169_p5), %v673_v19, 0.0  ;;  %v707_v28 = vmax.f32 (!%p1169_p5), %v675_v20, 0.0 }
 0x1bb   : > { %648 = vst [vmem:[#allocation2 + $0x58] sm:$0xff] %v616_v32  ;;  %664 = vst [vmem:[#allocation2 + $0xd8] sm:$0xff] %v632_v33  ;;  %1201 = vmatprep.subr.bf16.mxu0 (!%p1169_p5), %v1479_v0  ;;  %1278 = vmatprep.subr.bf16.mxu1 (!%p1169_p5), %v1479_v0  ;;  %v680_v24 = vld [vmem:[#allocation2 + $0x38] sm:$0xff] (!%p1169_p5)  ;;  %v694_v25 = vld [vmem:[#allocation2 + $0xa8] sm:$0xff] (!%p1169_p5)  ;;  %v721_v29 = vmax.f32 (!%p1169_p5), %v689_v21, 0.0  ;;  %v723_v30 = vmax.f32 (!%p1169_p5), %v691_v22, 0.0 }
 0x1bc   : > { %913 = vmatprep.mubr.bf16.mxu0 (!%p1169_p5), %v738_v14  ;;  %945 = vmatprep.mubr.bf16.mxu1 (!%p1169_p5), %v746_v16  ;;  %v696_v26 = vld [vmem:[#allocation2 + $0xb8] sm:$0xff] (!%p1169_p5)  ;;  %v710_v32 = vmax.f32 (!%p1169_p5), %v678_v23, 0.0  ;;  %v712_v33 = vmax.f32 (!%p1169_p5), %v680_v24, 0.0 }
 0x1bd   : > { %v556_v38 = vpop.f32.mrb[12].mxu0  ;;  %v596_v39 = vpop.f32.mrb[12].mxu1  ;;  %672 = sbr.rel (%p1169_p5) target bundleno = 707 (0x2c3), region = 52  ;;  %v1488_v31 = vld [vmem:[#allocation8 + $0x38] sm:$0xff] (!%p1169_p5)  }
 0x1be   : > { %v617_v42 = vadd.f32 %v556_v38, %v312_v34  ;;  %v633_v43 = vadd.f32 %v596_v39, %v328_v35  ;;  %v558_v44 = vpop.f32.mrb[13].mxu0  ;;  %v598_v45 = vpop.f32.mrb[13].mxu1  ;;  %1202 = vmatpush3.bf16.msra.mxu0 (!%p1169_p5), %v1480_v1  ;;  %1286 = vmatpush3.bf16.msra.mxu1 (!%p1169_p5), %v1480_v1  ;;  %v726_v34 = vmax.f32 (!%p1169_p5), %v694_v25, 0.0  ;;  %v728_v35 = vmax.f32 (!%p1169_p5), %v696_v26, 0.0  ;;  %v677_v38 = vld [vmem:[#allocation2 + $0x20] sm:$0xff] (!%p1169_p5)  ;;  %v679_v39 = vld [vmem:[#allocation2 + $0x30] sm:$0xff] (!%p1169_p5) }
 0x1bf   : > { %v618_v48 = vadd.f32 %v558_v44, %v313_v36  ;;  %v634_v49 = vadd.f32 %v598_v45, %v329_v37  ;;  %v560_v50 = vpop.f32.mrb[14].mxu0  ;;  %v600_v51 = vpop.f32.mrb[14].mxu1  ;;  %1203 = vmatprep.subr.bf16.mxu0 (!%p1169_p5), %v1481_v2  ;;  %1279 = vmatprep.subr.bf16.mxu1 (!%p1169_p5), %v1481_v2  ;;  %v737_v36 = vpack.c.bf16 (!%p1169_p5), %v707_v28, %v705_v27  ;;  %v681_v58 = vld [vmem:[#allocation2 + $0x40] sm:$0xff] (!%p1169_p5) }
 0x1c0   : > { %649 = vst [vmem:[#allocation2 + $0x60] sm:$0xff] %v617_v42  ;;  %665 = vst [vmem:[#allocation2 + $0xe0] sm:$0xff] %v633_v43  ;;  %v619_v52 = vadd.f32 %v560_v50, %v314_v40  ;;  %v635_v53 = vadd.f32 %v600_v51, %v330_v41  ;;  %v562_v54 = vpop.f32.mrb[15].mxu0  ;;  %v602_v55 = vpop.f32.mrb[15].mxu1  ;;  %v745_v37 = vpack.c.bf16 (!%p1169_p5), %v723_v30, %v721_v29  ;;  %v693_v42 = vld [vmem:[#allocation2 + $0xa0] sm:$0xff] (!%p1169_p5)  ;;  %v695_v43 = vld [vmem:[#allocation2 + $0xb0] sm:$0xff] (!%p1169_p5) }
 0x1c1   : > { %650 = vst [vmem:[#allocation2 + $0x68] sm:$0xff] %v618_v48  ;;  %666 = vst [vmem:[#allocation2 + $0xe8] sm:$0xff] %v634_v49  ;;  %v620_v56 = vadd.f32 %v562_v54, %v315_v46  ;;  %v636_v57 = vadd.f32 %v602_v55, %v331_v47  ;;  %v740_v40 = vpack.c.bf16 (!%p1169_p5), %v712_v33, %v710_v32  ;;  %v682_v44 = vld [vmem:[#allocation2 + $0x48] sm:$0xff] (!%p1169_p5)  ;;  %v709_v48 = vmax.f32 (!%p1169_p5), %v677_v38, 0.0  ;;  %v683_v59 = vld [vmem:[#allocation2 + $0x50] sm:$0xff] (!%p1169_p5) }
 0x1c2   : > { %651 = vst [vmem:[#allocation2 + $0x70] sm:$0xff] %v619_v52  ;;  %667 = vst [vmem:[#allocation2 + $0xf0] sm:$0xff] %v635_v53  ;;  %1204 = vmatpush3.bf16.msra.mxu0 (!%p1169_p5), %v1482_v3  ;;  %1287 = vmatpush3.bf16.msra.mxu1 (!%p1169_p5), %v1482_v3  ;;  %v748_v41 = vpack.c.bf16 (!%p1169_p5), %v728_v35, %v726_v34  ;;  %v684_v45 = vld [vmem:[#allocation2 + $0x58] sm:$0xff] (!%p1169_p5)  ;;  %v698_v46 = vld [vmem:[#allocation2 + $0xc8] sm:$0xff] (!%p1169_p5)  ;;  %v711_v49 = vmax.f32 (!%p1169_p5), %v679_v39, 0.0  ;;  %v725_v50 = vmax.f32 (!%p1169_p5), %v693_v42, 0.0 }
 0x1c3   : > { %652 = vst [vmem:[#allocation2 + $0x78] sm:$0xff] %v620_v56  ;;  %668 = vst [vmem:[#allocation2 + $0xf8] sm:$0xff] %v636_v57  ;;  %1205 = vmatprep.subr.bf16.mxu0 (!%p1169_p5), %v1483_v4  ;;  %1280 = vmatprep.subr.bf16.mxu1 (!%p1169_p5), %v1483_v4  ;;  %v700_v47 = vld [vmem:[#allocation2 + $0xd8] sm:$0xff] (!%p1169_p5)  ;;  %v727_v51 = vmax.f32 (!%p1169_p5), %v695_v43, 0.0  ;;  %v714_v52 = vmax.f32 (!%p1169_p5), %v682_v44, 0.0  ;;  %v716_v53 = vmax.f32 (!%p1169_p5), %v684_v45, 0.0 }
 0x1c4   : > { %v730_v54 = vmax.f32 %v698_v46, 0.0  ;;  %v732_v55 = vmax.f32 %v700_v47, 0.0  ;;  %v739_v56 = vpack.c.bf16 %v711_v49, %v709_v48  ;;  %v697_v62 = vld [vmem:[#allocation2 + $0xc0] sm:$0xff]  ;;  %v699_v63 = vld [vmem:[#allocation2 + $0xd0] sm:$0xff]  ;;  %v713_v4 = vmax.f32 %v681_v58, 0.0 }
 0x1c5   : > { %v747_v57 = vpack.c.bf16 %v727_v51, %v725_v50  ;;  %v742_v60 = vpack.c.bf16 %v716_v53, %v714_v52  ;;  %v715_v5 = vmax.f32 %v683_v59, 0.0  ;;  %v729_v6 = vmax.f32 %v697_v62, 0.0 }
 0x1c6   : > { %1206 = vmatpush3.bf16.msra.mxu0 %v1484_v13  ;;  %1288 = vmatpush3.bf16.msra.mxu1 %v1484_v13  ;;  %v750_v61 = vpack.c.bf16 %v732_v55, %v730_v54  ;;  %v731_v7 = vmax.f32 %v699_v63, 0.0 }
 0x1c7   : > { %1207 = vmatprep.subr.bf16.mxu0 %v1485_v15  ;;  %1281 = vmatprep.subr.bf16.mxu1 %v1485_v15  ;;  %v741_v12 = vpack.c.bf16 %v715_v5, %v713_v4  ;;  %v685_v14 = vld [vmem:[#allocation2 + $0x60] sm:$0xff] }
 0x1c8   : > { %v686_v0 = vld [vmem:[#allocation2 + $0x68] sm:$0xff]  ;;  %v749_v13 = vpack.c.bf16 %v731_v7, %v729_v6  ;;  %v717_v20 = vmax.f32 %v685_v14, 0.0 }
 0x1c9   : > { %v702_v2 = vld [vmem:[#allocation2 + $0xe8] sm:$0xff]  ;;  %v718_v8 = vmax.f32 %v686_v0, 0.0  ;;  %v703_v19 = vld [vmem:[#allocation2 + $0xf0] sm:$0xff] }
 0x1ca   : > { %1208 = vmatpush3.bf16.msra.mxu0 %v1486_v17  ;;  %1289 = vmatpush3.bf16.msra.mxu1 %v1486_v17  ;;  %v688_v1 = vld [vmem:[#allocation2 + $0x78] sm:$0xff]  ;;  %v734_v10 = vmax.f32 %v702_v2, 0.0  ;;  %v687_v17 = vld [vmem:[#allocation2 + $0x70] sm:$0xff]  ;;  %v735_v23 = vmax.f32 %v703_v19, 0.0 }
 0x1cb   : > { %1209 = vmatprep.subr.bf16.mxu0 %v1487_v18  ;;  %1282 = vmatprep.subr.bf16.mxu1 %v1487_v18  ;;  %v704_v3 = vld [vmem:[#allocation2 + $0xf8] sm:$0xff]  ;;  %v720_v9 = vmax.f32 %v688_v1, 0.0  ;;  %v701_v18 = vld [vmem:[#allocation2 + $0xe0] sm:$0xff]  ;;  %v719_v21 = vmax.f32 %v687_v17, 0.0 }
 0x1cc   : > { %v736_v11 = vmax.f32 %v704_v3, 0.0  ;;  %v733_v22 = vmax.f32 %v701_v18, 0.0 }
 0x1cd   : > { %v744_v15 = vpack.c.bf16 %v720_v9, %v718_v8  ;;  %v743_v24 = vpack.c.bf16 %v719_v21, %v717_v20 }
 0x1ce   : > { %1210 = vmatpush3.bf16.msra.mxu0 %v1488_v31  ;;  %1290 = vmatpush3.bf16.msra.mxu1 %v1488_v31  ;;  %v752_v16 = vpack.c.bf16 %v736_v11, %v734_v10  ;;  %v751_v25 = vpack.c.bf16 %v735_v23, %v733_v22 }
 0x1d1   : > { %914 = vmatmul.mubr.bf16.vlgmr.msra.gmra.mrb[0].mxu0 %v737_v36  ;;  %946 = vmatmul.mubr.bf16.vlgmr.msra.gmra.mrb[0].mxu1 %v745_v37 }
 0x1d2   : > { %921 = vmatprep.mubr.bf16.mxu0 %v740_v40  ;;  %953 = vmatprep.mubr.bf16.mxu1 %v748_v41 }
 0x1d9   : > { %922 = vmatmul.mubr.bf16.gmra.mrb[4].mxu0 %v739_v56  ;;  %954 = vmatmul.mubr.bf16.gmra.mrb[4].mxu1 %v747_v57 }
 0x1da   : > { %929 = vmatprep.mubr.bf16.mxu0 %v742_v60  ;;  %961 = vmatprep.mubr.bf16.mxu1 %v750_v61 }
 0x1e1   : > { %930 = vmatmul.mubr.bf16.gmra.mrb[8].mxu0 %v741_v12  ;;  %962 = vmatmul.mubr.bf16.gmra.mrb[8].mxu1 %v749_v13 }
 0x1e2   : > { %937 = vmatprep.mubr.bf16.mxu0 %v744_v15  ;;  %969 = vmatprep.mubr.bf16.mxu1 %v752_v16 }
 0x1e9   : > { %938 = vmatmul.mubr.bf16.gmra.mrb[12].mxu0 %v743_v24  ;;  %970 = vmatmul.mubr.bf16.gmra.mrb[12].mxu1 %v751_v25 }
 0x2a4   : > { %v1211_v26 = vpop.f32.mrb[0].mxu0  ;;  %v1235_v27 = vpop.f32.mrb[0].mxu1 }
 0x2a5   : > { %v1212_v28 = vpop.f32.mrb[1].mxu0  ;;  %v1236_v29 = vpop.f32.mrb[1].mxu1 }
 0x2a6   : > { %v1213_v30 = vadd.f32 %v1212_v28, %v1211_v26  ;;  %v1237_v31 = vadd.f32 %v1236_v29, %v1235_v27  ;;  %v1214_v32 = vpop.f32.mrb[2].mxu0  ;;  %v1238_v33 = vpop.f32.mrb[2].mxu1 }
 0x2a7   : > { %v1215_v34 = vpop.f32.mrb[3].mxu0  ;;  %v1239_v35 = vpop.f32.mrb[3].mxu1 }
 0x2a8   : > { %978 = vst [vmem:[%s2062_s5] sm:$0xff] %v1213_v30  ;;  %986 = vst [vmem:[%s2062_s5 + $0x40] sm:$0xff] %v1237_v31  ;;  %v1216_v36 = vadd.f32 %v1215_v34, %v1214_v32  ;;  %v1240_v37 = vadd.f32 %v1239_v35, %v1238_v33 }
 0x2aa   : > { %979 = vst [vmem:[%s2062_s5 + $0x8] sm:$0xff] %v1216_v36  ;;  %987 = vst [vmem:[%s2062_s5 + $0x48] sm:$0xff] %v1240_v37 }
 0x2ac   : > { %v1217_v38 = vpop.f32.mrb[4].mxu0  ;;  %v1241_v39 = vpop.f32.mrb[4].mxu1 }
 0x2ad   : > { %v1218_v40 = vpop.f32.mrb[5].mxu0  ;;  %v1242_v41 = vpop.f32.mrb[5].mxu1 }
 0x2ae   : > { %v1219_v42 = vadd.f32 %v1218_v40, %v1217_v38  ;;  %v1243_v43 = vadd.f32 %v1242_v41, %v1241_v39  ;;  %v1220_v44 = vpop.f32.mrb[6].mxu0  ;;  %v1244_v45 = vpop.f32.mrb[6].mxu1 }
 0x2af   : > { %v1221_v46 = vpop.f32.mrb[7].mxu0  ;;  %v1245_v47 = vpop.f32.mrb[7].mxu1 }
 0x2b0   : > { %980 = vst [vmem:[%s2062_s5 + $0x10] sm:$0xff] %v1219_v42  ;;  %988 = vst [vmem:[%s2062_s5 + $0x50] sm:$0xff] %v1243_v43  ;;  %v1222_v48 = vadd.f32 %v1221_v46, %v1220_v44  ;;  %v1246_v49 = vadd.f32 %v1245_v47, %v1244_v45 }
 0x2b2   : > { %981 = vst [vmem:[%s2062_s5 + $0x18] sm:$0xff] %v1222_v48  ;;  %989 = vst [vmem:[%s2062_s5 + $0x58] sm:$0xff] %v1246_v49 }
 0x2b4   : > { %v1223_v50 = vpop.f32.mrb[8].mxu0  ;;  %v1247_v51 = vpop.f32.mrb[8].mxu1 }
 0x2b5   : > { %v1224_v52 = vpop.f32.mrb[9].mxu0  ;;  %v1248_v53 = vpop.f32.mrb[9].mxu1 }
 0x2b6   : > { %v1225_v54 = vadd.f32 %v1224_v52, %v1223_v50  ;;  %v1249_v55 = vadd.f32 %v1248_v53, %v1247_v51  ;;  %v1226_v56 = vpop.f32.mrb[10].mxu0  ;;  %v1250_v57 = vpop.f32.mrb[10].mxu1 }
 0x2b7   : > { %v1227_v58 = vpop.f32.mrb[11].mxu0  ;;  %v1251_v59 = vpop.f32.mrb[11].mxu1 }
 0x2b8   : > { %982 = vst [vmem:[%s2062_s5 + $0x20] sm:$0xff] %v1225_v54  ;;  %990 = vst [vmem:[%s2062_s5 + $0x60] sm:$0xff] %v1249_v55  ;;  %v1228_v60 = vadd.f32 %v1227_v58, %v1226_v56  ;;  %v1252_v61 = vadd.f32 %v1251_v59, %v1250_v57 }
 0x2ba   : > { %983 = vst [vmem:[%s2062_s5 + $0x28] sm:$0xff] %v1228_v60  ;;  %991 = vst [vmem:[%s2062_s5 + $0x68] sm:$0xff] %v1252_v61 }
 0x2bc   : > { %v1229_v62 = vpop.f32.mrb[12].mxu0  ;;  %v1253_v63 = vpop.f32.mrb[12].mxu1 }
 0x2bd   : > { %v1230_v0 = vpop.f32.mrb[13].mxu0  ;;  %v1254_v1 = vpop.f32.mrb[13].mxu1 }
 0x2be   : > { %v1231_v2 = vadd.f32 %v1230_v0, %v1229_v62  ;;  %v1255_v3 = vadd.f32 %v1254_v1, %v1253_v63  ;;  %v1232_v4 = vpop.f32.mrb[14].mxu0  ;;  %v1256_v5 = vpop.f32.mrb[14].mxu1 }
 0x2bf   : > { %v1233_v6 = vpop.f32.mrb[15].mxu0  ;;  %v1257_v7 = vpop.f32.mrb[15].mxu1 }
 0x2c0   : > { %984 = vst [vmem:[%s2062_s5 + $0x30] sm:$0xff] %v1231_v2  ;;  %992 = vst [vmem:[%s2062_s5 + $0x70] sm:$0xff] %v1255_v3  ;;  %v1234_v8 = vadd.f32 %v1233_v6, %v1232_v4  ;;  %v1258_v9 = vadd.f32 %v1257_v7, %v1256_v5 }
 0x2c2   : > { %985 = vst [vmem:[%s2062_s5 + $0x38] sm:$0xff] %v1234_v8  ;;  %993 = vst [vmem:[%s2062_s5 + $0x78] sm:$0xff] %v1258_v9 }
 0x2c3 PF: > { %s2262_s4 = sld [smem:[#allocation17_spill]]  ;;  %s2264_s28 = sld [smem:[#allocation20_spill]] }
 0x2c4   : > { %s2265_s3 = sld [smem:[#allocation24_spill]]  ;;  %s1008_s11 = sshll.u32 %s2062_s5, 4  ;;  %s2121_s11 = int_to_ptr.vmem [resolvable:$true] %s1008_s11 }
 0x2c5   : > { %s2125_s6 = scalar_lea.sflag [#allocation5], %s257_s22  ;;  %s1577_s9 = scalar_lea.vmem %s2121_s11, 2048 }
 0x2c6   : > { %p1578_p2 = scmp.ne.s32.totalorder %s2121_s11, %s1577_s9  ;;  %s1742_s29 = smov [#allocation9]  }
 0x2c7   : > { %s1581_s7 = sshll.u32 %s1742_s29, 4  ;;  %s1582_s7 = int_to_ptr.vmem [resolvable:$false] %s1581_s7 }
 0x2c8   : > { %s1583_s26 = scalar_lea.vmem %s1582_s7, 4096  ;;  %p1584_p4 = scmp.lt.s32.totalorder %s2121_s11, %s1582_s7 }
 0x2c9   : > { %s1194_s27 = sshll.u32 %s2262_s4, 11  ;;  %p2266_p10 = scmp.ne.s32.totalorder %s2264_s28, 0 }
 0x2ca   : > { %s2118_s13 = scalar_lea.hbm %s2265_s3, %s1194_s27  ;;  %p1585_p8 = scmp.lt.s32.totalorder %s1583_s26, %s1577_s9 }
 0x2cb   : > { %p1579_p0 = pnand %p1578_p2, %p2266_p10 }
 0x2cc   : > { %p1586_p12 = por %p1585_p8, %p1584_p4 }
 0x2cd   : > { %p1580_p11 = pneg %p1579_p0 }
 0x2cf   : > { %p1587_p13 = pnand %p1586_p12, %p1580_p11 }
 0x2d1   : > { %1590 = shalt.err (!%p1587_p13)
}
 0x2d2   : > { %s1591_s22 = scalar_lea.hbm %s2118_s13, 2048  ;;  %s1595_s4 = scalar_lea.hbm %s2265_s3, 4096 }
 0x2d3   : > { %p1592_p6 = scmp.ne.s32.totalorder %s2118_s13, %s1591_s22  ;;  %p1596_p3 = scmp.lt.u32.totalorder %s2118_s13, %s2265_s3 }
 0x2d4   : > { %p1597_p9 = scmp.lt.u32.totalorder %s1595_s4, %s1591_s22  ;;  %p1599_p2 = scmp.lt.u32.totalorder %s1591_s22, %s2118_s13 }
 0x2d5   : > { %p1593_p7 = pnand %p1592_p6, %p2266_p10 }
 0x2d6   : > { %p1598_p5 = por %p1597_p9, %p1596_p3 }
 0x2d7   : > { %p1594_p1 = pneg %p1593_p7 }
 0x2d8   : > { %p1600_p0 = por %p1599_p2, %p1598_p5 }
 0x2da   : > { %p1601_p11 = pnand %p1600_p0, %p1594_p1 }
 0x2dc   : > { %1604 = shalt.err (!%p1601_p11)
}
 0x2dd   : > { %s1743_s21 = smov 128   ;;  %s1744_s8 = smov 8  }
 0x2de   : > { %1299 = dma.vmem_to_hbm [thread:$0]  (%p2266_p10), %s2121_s11, 2048, %s2118_s13, %s2125_s6, %s1743_s21, %s1743_s21, %s1744_s8  }
 0x2df PF: > { %s2267_s9 = sld [smem:[#allocation14_spill]]  ;;  %s2268_s29 = sld [smem:[#allocation21_spill]] }
 0x2e0   : > { %p1319_p4 = scmp.ge.s32.totalorder %s1731_s25, 2 }
 0x2e5   : > { %s1023_s7 = sand.u32 1, %s2267_s9   ;;  %p2269_p8 = scmp.ne.s32.totalorder %s2268_s29, 0 }
 0x2e6   : > { %s1024_s26 = scalar_lea.sflag [#allocation5], %s1023_s7 }
 0x2e7   : > { %p1313_p12 = pnand %p1319_p4, %p2269_p8 }
 0x2e9   : > { %1674 = dma.done.wait (!%p1313_p12), %s1024_s26, 2048  }
 0x2ea   : > { %1676 = vsyncadd (!%p1313_p12), %s1024_s26, 4294965248  ;;  %s22_s25 = sadd.s32 1, %s1731_s25   ;;  %s2271_s5 = sld [smem:[#allocation15_spill]] }
 0x2eb   : > { %p2154_p13 = scmp.ge.s32.totalorder %s22_s25, 6   ;;  %s2272_s28 = smov %s1931_s12 }
 0x2ec   : > { %s2273_s11 = sld [smem:[#allocation22_spill]]  ;;  %s2274_s6 = smov %s2294_s18 }
 0x2ed   : > { %s2277_s13 = smov %s1687_s14  ;;  %s2278_s14 = smov %s1928_s15 }
 0x2ee   : > { %s2279_s15 = smov %s1695_s16  ;;  %s2280_s16 = smov %s1699_s17 }
 0x2ef   : > { %s2281_s17 = smov %s1987_s2  ;;  %s2282_s18 = smov %s1707_s19 }
 0x2f0   : > { %s2276_s12 = smov %s2271_s5  ;;  %s2283_s19 = smov %s1711_s20 }
 0x2f1   : > { %s2284_s20 = smov %s2272_s28  ;;  %s2285_s21 = smov %s1723_s23 }
 0x2f2   : > { %s2286_s22 = smov %s1727_s24  ;;  %s2287_s23 = smov %s2273_s11 }
 0x2f3   : > { %s2288_s24 = smov %s2274_s6  ;;  %21 = sbr.rel (!%p2154_p13) target bundleno = 15 (0xf), region = 102 }
 0x2fa   :  { %1029 = vsyncpa [#allocation4], 1 }
 0x2fb   :  { %1031 = vsyncpa [#allocation4 + $0x1], 1 }
 0x2fc   :  { %1032 = vsyncpa [#allocation7], 1 }
 0x2fd   :  { %1034 = vsyncpa [#allocation7 + $0x1], 1 }
 0x2fe   :  { %1035 = vsyncpa [#allocation5], 1 }
 0x2ff   :  { %1037 = vsyncpa [#allocation5 + $0x1], 1 }

</bundles_post_ra>
